<compile_context>
chip_gen: v6e
topology: v6e:2x2x1
jax: 0.10.0
libtpu: 0.0.40
codegen_flags: <defaults>
</compile_context>

<pallas_src>
import jax
import jax.numpy as jnp
from jax.experimental import pallas as pl
from jax.experimental.pallas import tpu as pltpu

N_LAYERS = 8       # down1..down5, up1..up3


# --------------------------------------------------------------------------
# Kernel
# --------------------------------------------------------------------------
def bnorm_ae_kernel(x_ref, w_ref, b_ref, y_ref, z_ref):
    """One (TB, PAD) packed batch tile through the whole 8-layer chain.

    x_ref: (TB, PAD)           bf16  packed input tile (pack samples per row)
    w_ref: (8, PAD, PAD)       bf16  block-diagonal packed weights (in, out)
    b_ref: (8, PAD)            f32   packed biases (replicated per slot)
    y_ref: (TB, PAD)           f32   reconstruction slab
    z_ref: (TB, PAD)           f32   bottleneck slab
    """
    biases = b_ref[...]                              # one clean (8, PAD) load

    def lin(h_bf16, layer):
        # bf16 operands on the MXU, f32 accumulation, f32 bias add.
        acc = jnp.dot(h_bf16, w_ref[layer],
                      preferred_element_type=jnp.float32)
        return acc + biases[layer:layer + 1, :]

    h = x_ref[...]                                   # bf16 already
    for l in range(4):                               # down1..down4 + relu
        h = jnp.maximum(lin(h, l), 0.0).astype(jnp.bfloat16)

    z = lin(h, 4)                                    # down5 (no relu) -> bottleneck
    z_ref[...] = z

    y = z.astype(jnp.bfloat16)
    for l in (5, 6):                                 # up1, up2 + relu
        y = jnp.maximum(lin(y, l), 0.0).astype(jnp.bfloat16)
    y_ref[...] = lin(y, 7)                           # up3 (no relu)


# --------------------------------------------------------------------------
# Helpers
# --------------------------------------------------------------------------
def _cdiv(a, b):
    return -(-a // b)


def _round_up(x, m):
    return ((x + m - 1) // m) * m


def _pick_pad():
    """256-lane slabs on 256-wide MXUs (v6e/v7x), 128 otherwise."""
    try:
        kind = jax.devices()[0].device_kind.lower()
        if "v6" in kind or "v7" in kind:
            return 256
    except Exception:
        pass
    return 128


def init_linear_params(key, in_features, out_features, dtype=jnp.float32):
    """Deterministic PyTorch-style init: U(-1/sqrt(fan_in), 1/sqrt(fan_in))."""
    kw, kb = jax.random.split(key)
    bound = 1.0 / jnp.sqrt(jnp.asarray(in_features, dtype))
    w = jax.random.uniform(kw, (in_features, out_features), dtype,
                           minval=-bound, maxval=bound)
    b = jax.random.uniform(kb, (out_features,), dtype,
                           minval=-bound, maxval=bound)
    return w, b


def layer_dims(ch_count, reduce_dims):
    dims_in = [
        ch_count,
        ch_count - 3,
        ch_count - 6,
        ch_count - 6 - reduce_dims // 3,
        ch_count - 6 - 2 * reduce_dims // 3,
        ch_count - 6 - reduce_dims,                 # up1 in
        ch_count - 6 - 2 * reduce_dims // 3,        # up2 in
        ch_count - 6 - reduce_dims // 3,            # up3 in
    ]
    dims_out = [
        ch_count - 3,
        ch_count - 6,
        ch_count - 6 - reduce_dims // 3,
        ch_count - 6 - 2 * reduce_dims // 3,
        ch_count - 6 - reduce_dims,                 # bottleneck
        ch_count - 6 - 2 * reduce_dims // 3,
        ch_count - 6 - reduce_dims // 3,
        ch_count - 6,                               # reconstruction
    ]
    return dims_in, dims_out


# --------------------------------------------------------------------------
# Model builder + forward wrapper
# --------------------------------------------------------------------------
def make_bnorm_ae(ch_count, reduce_dims, key, pad=None):
    """Builds params and returns (params, packed, forward). forward(x) -> (y, z)."""
    if pad is None:
        pad = _pick_pad()
    assert ch_count <= pad, "feature width must fit one lane slab"

    dims_in, dims_out = layer_dims(ch_count, reduce_dims)
    keys = jax.random.split(key, N_LAYERS)
    params = [init_linear_params(k, fi, fo)
              for k, fi, fo in zip(keys, dims_in, dims_out)]

    slot = ch_count                 # lane width reserved per sample
    pack = max(1, pad // slot)      # samples packed per 128/256-lane row

    # Block-diagonal packed weights / biases (done once, host/XLA side).
    w_all = jnp.zeros((N_LAYERS, pad, pad), jnp.float32)
    b_all = jnp.zeros((N_LAYERS, pad), jnp.float32)
    for l, (w, b) in enumerate(params):
        fi, fo = w.shape
        for p in range(pack):
            o = p * slot
            w_all = w_all.at[l, o:o + fi, o:o + fo].set(w)
            b_all = b_all.at[l, o:o + fo].set(b)
    w_all = w_all.astype(jnp.bfloat16)      # bf16 operands for the MXU
    packed = (w_all, b_all)

    out_dim = dims_out[-1]          # ch_count - 6
    bottleneck_dim = dims_out[4]    # ch_count - 6 - reduce_dims

    def forward(x):
        batch = x.shape[0]
        rows = _cdiv(batch, pack)

        # Batch tile: up to 2048 rows, but capped at ceil(rows/2) so the grid
        # has >= 2 steps when there is enough work (keeps both v7x TCs busy).
        tb = max(8, min(2048, _round_up(_cdiv(rows, 2), 8)))
        b_pad = _round_up(rows, tb)
        grid = (b_pad // tb,)

        # Host-side sample packing: (batch, C) -> (rows, pack*C) bf16.
        # When pack*C == PAD (e.g. ch_count==32) the reshape is free.
        xb = x.astype(jnp.bfloat16)
        n_pack = rows * pack
        if n_pack != batch:
            xb = jnp.pad(xb, ((0, n_pack - batch), (0, 0)))
        xb = xb.reshape(rows, pack * slot)
        if pack * slot != pad:
            xb = jnp.pad(xb, ((0, 0), (0, pad - pack * slot)))
        if b_pad != rows:
            xb = jnp.pad(xb, ((0, b_pad - rows), (0, 0)))

        y_p, z_p = pl.pallas_call(
            bnorm_ae_kernel,
            grid=grid,
            in_specs=[
                pl.BlockSpec((tb, pad), lambda i: (i, 0)),                # x tile
                pl.BlockSpec((N_LAYERS, pad, pad), lambda i: (0, 0, 0)),  # weights (resident)
                pl.BlockSpec((N_LAYERS, pad), lambda i: (0, 0)),          # biases  (resident)
            ],
            out_specs=(
                pl.BlockSpec((tb, pad), lambda i: (i, 0)),                # y slab
                pl.BlockSpec((tb, pad), lambda i: (i, 0)),                # z slab
            ),
            out_shape=(
                jax.ShapeDtypeStruct((b_pad, pad), jnp.float32),
                jax.ShapeDtypeStruct((b_pad, pad), jnp.float32),
            ),
            compiler_params=pltpu.CompilerParams(
                dimension_semantics=("parallel",),
                vmem_limit_bytes=32 * 1024 * 1024),
        )(xb, w_all, b_all)

        # Un-pack samples and slice back to the real feature widths.
        def unpack(slab, width):
            s = slab[:rows, :pack * slot].reshape(rows * pack, slot)
            return s[:batch, :width].astype(x.dtype)

        return unpack(y_p, out_dim), unpack(z_p, bottleneck_dim)

    return params, packed, forward


# --------------------------------------------------------------------------
# References
# --------------------------------------------------------------------------
def reference_forward_f32(x, params):
    """Pure f32 plain-JAX reference (PyTorch semantics)."""
    h = x.astype(jnp.float32)
    for i in range(4):
        w, b = params[i]
        h = jnp.maximum(h @ w + b, 0.0)
    w, b = params[4]
    z = h @ w + b
    y = z
    for i in range(5, 7):
        w, b = params[i]
        y = jnp.maximum(y @ w + b, 0.0)
    w, b = params[7]
    y = y @ w + b
    return y, z


def reference_forward_bf16(x, params):
    """Reference mirroring the kernel's bf16-operand / f32-accumulate numerics."""
    def lin(h, w, b):
        return jnp.dot(h.astype(jnp.bfloat16), w.astype(jnp.bfloat16),
                       preferred_element_type=jnp.float32) + b
    h = x.astype(jnp.float32)
    for i in range(4):
        w, b = params[i]
        h = jnp.maximum(lin(h, w, b), 0.0)
    w, b = params[4]
    z = lin(h, w, b)
    y = z
    for i in range(5, 7):
        w, b = params[i]
        y = jnp.maximum(lin(y, w, b), 0.0)
    w, b = params[7]
    y = lin(y, w, b)
    return y, z


# --------------------------------------------------------------------------
# Demo / self-check
# --------------------------------------------------------------------------
if __name__ == "__main__":
    key = jax.random.PRNGKey(0)
    k_params, k_input = jax.random.split(key)

    ch_count = 32
    reduce_dims = 12
    batch = 8

    params, packed, forward = make_bnorm_ae(ch_count, reduce_dims, k_params)

    x = jax.random.normal(k_input, (batch, ch_count), dtype=jnp.float32)

    y, z = forward(x)
    jax.block_until_ready((y, z))

    assert y.shape == (batch, ch_count - 6)
    assert z.shape == (batch, ch_count - 6 - reduce_dims)

    # Logic check against a reference with identical bf16/f32 numerics.
    y_ref_b, z_ref_b = reference_forward_bf16(x, params)
    assert jnp.allclose(y, y_ref_b, atol=1e-3, rtol=1e-3)
    assert jnp.allclose(z, z_ref_b, atol=1e-3, rtol=1e-3)

    # Semantic check against the pure-f32 PyTorch-equivalent reference
    # (loose tolerance accounts for bf16 weight/operand quantization).
    y_ref, z_ref = reference_forward_f32(x, params)
    assert jnp.allclose(y, y_ref, atol=5e-2, rtol=5e-2)
    assert jnp.allclose(z, z_ref, atol=5e-2, rtol=5e-2)

    print("KERNEL_OK")
</pallas_src>

<mosaic_0001>
module attributes {stable_mosaic.version = 11 : i64} {
  func.func @bnorm_ae_kernel(%arg0: i32, %arg1: memref<8x128xbf16, #tpu.memory_space<vmem>>, %arg2: memref<8x128x128xbf16, #tpu.memory_space<vmem>>, %arg3: memref<8x128xf32, #tpu.memory_space<vmem>>, %arg4: memref<8x128xf32, #tpu.memory_space<vmem>>, %arg5: memref<8x128xf32, #tpu.memory_space<vmem>>) attributes {dimension_semantics = [#tpu.dimension_semantics<parallel>], iteration_bounds = array<i64: 1>, scalar_prefetch = 0 : i64, scratch_operands = 0 : i64, tpu.core_type = #tpu.core_type<tc>, window_params = [{transform_indices = @transform_0, window_bounds = array<i64: 8, 128>}, {pipeline_mode = #tpu.pipeline_mode<synchronous>, transform_indices = @transform_1, window_bounds = array<i64: 8, 128, 128>}, {pipeline_mode = #tpu.pipeline_mode<synchronous>, transform_indices = @transform_2, window_bounds = array<i64: 8, 128>}, {transform_indices = @transform_3, window_bounds = array<i64: 8, 128>}, {transform_indices = @transform_4, window_bounds = array<i64: 8, 128>}]} {
    %c0 = arith.constant 0 : index
    %c0_0 = arith.constant 0 : index
    %0 = vector.load %arg3[%c0, %c0_0] : memref<8x128xf32, #tpu.memory_space<vmem>>, vector<8x128xf32>
    %c0_1 = arith.constant 0 : index
    %c0_2 = arith.constant 0 : index
    %1 = vector.load %arg1[%c0_1, %c0_2] : memref<8x128xbf16, #tpu.memory_space<vmem>>, vector<8x128xbf16>
    %c0_3 = arith.constant 0 : index
    %c0_4 = arith.constant 0 : index
    %c0_5 = arith.constant 0 : index
    %2 = vector.load %arg2[%c0_3, %c0_4, %c0_5] : memref<8x128x128xbf16, #tpu.memory_space<vmem>>, vector<1x128x128xbf16>
    %3 = vector.shape_cast %2 : vector<1x128x128xbf16> to vector<128x128xbf16>
    %cst = arith.constant dense<0.000000e+00> : vector<8x128xf32>
    %4 = tpu.matmul %1, %3, %cst {dimension_numbers = #tpu.dot_dimension_numbers<[1], [0], [0], [1], [0, 0, 1, 1], [], []>} : vector<8x128xbf16>, vector<128x128xbf16>, vector<8x128xf32> -> vector<8x128xf32>
    %5 = vector.extract_strided_slice %0 {offsets = [0, 0], sizes = [1, 128], strides = [1, 1]} : vector<8x128xf32> to vector<1x128xf32>
    %6 = vector.broadcast %5 : vector<1x128xf32> to vector<8x128xf32>
    %7 = arith.addf %4, %6 : vector<8x128xf32>
    %cst_6 = arith.constant 0.000000e+00 : f32
    %8 = vector.broadcast %cst_6 : f32 to vector<8x128xf32>
    %9 = arith.maximumf %7, %8 : vector<8x128xf32>
    %10 = arith.truncf %9 : vector<8x128xf32> to vector<8x128xbf16>
    %c1 = arith.constant 1 : index
    %c0_7 = arith.constant 0 : index
    %c0_8 = arith.constant 0 : index
    %11 = vector.load %arg2[%c1, %c0_7, %c0_8] : memref<8x128x128xbf16, #tpu.memory_space<vmem>>, vector<1x128x128xbf16>
    %12 = vector.shape_cast %11 : vector<1x128x128xbf16> to vector<128x128xbf16>
    %cst_9 = arith.constant dense<0.000000e+00> : vector<8x128xf32>
    %13 = tpu.matmul %10, %12, %cst_9 {dimension_numbers = #tpu.dot_dimension_numbers<[1], [0], [0], [1], [0, 0, 1, 1], [], []>} : vector<8x128xbf16>, vector<128x128xbf16>, vector<8x128xf32> -> vector<8x128xf32>
    %14 = vector.extract_strided_slice %0 {offsets = [1, 0], sizes = [1, 128], strides = [1, 1]} : vector<8x128xf32> to vector<1x128xf32>
    %15 = vector.broadcast %14 : vector<1x128xf32> to vector<8x128xf32>
    %16 = arith.addf %13, %15 : vector<8x128xf32>
    %cst_10 = arith.constant 0.000000e+00 : f32
    %17 = vector.broadcast %cst_10 : f32 to vector<8x128xf32>
    %18 = arith.maximumf %16, %17 : vector<8x128xf32>
    %19 = arith.truncf %18 : vector<8x128xf32> to vector<8x128xbf16>
    %c2 = arith.constant 2 : index
    %c0_11 = arith.constant 0 : index
    %c0_12 = arith.constant 0 : index
    %20 = vector.load %arg2[%c2, %c0_11, %c0_12] : memref<8x128x128xbf16, #tpu.memory_space<vmem>>, vector<1x128x128xbf16>
    %21 = vector.shape_cast %20 : vector<1x128x128xbf16> to vector<128x128xbf16>
    %cst_13 = arith.constant dense<0.000000e+00> : vector<8x128xf32>
    %22 = tpu.matmul %19, %21, %cst_13 {dimension_numbers = #tpu.dot_dimension_numbers<[1], [0], [0], [1], [0, 0, 1, 1], [], []>} : vector<8x128xbf16>, vector<128x128xbf16>, vector<8x128xf32> -> vector<8x128xf32>
    %23 = vector.extract_strided_slice %0 {offsets = [2, 0], sizes = [1, 128], strides = [1, 1]} : vector<8x128xf32> to vector<1x128xf32>
    %24 = vector.broadcast %23 : vector<1x128xf32> to vector<8x128xf32>
    %25 = arith.addf %22, %24 : vector<8x128xf32>
    %cst_14 = arith.constant 0.000000e+00 : f32
    %26 = vector.broadcast %cst_14 : f32 to vector<8x128xf32>
    %27 = arith.maximumf %25, %26 : vector<8x128xf32>
    %28 = arith.truncf %27 : vector<8x128xf32> to vector<8x128xbf16>
    %c3 = arith.constant 3 : index
    %c0_15 = arith.constant 0 : index
    %c0_16 = arith.constant 0 : index
    %29 = vector.load %arg2[%c3, %c0_15, %c0_16] : memref<8x128x128xbf16, #tpu.memory_space<vmem>>, vector<1x128x128xbf16>
    %30 = vector.shape_cast %29 : vector<1x128x128xbf16> to vector<128x128xbf16>
    %cst_17 = arith.constant dense<0.000000e+00> : vector<8x128xf32>
    %31 = tpu.matmul %28, %30, %cst_17 {dimension_numbers = #tpu.dot_dimension_numbers<[1], [0], [0], [1], [0, 0, 1, 1], [], []>} : vector<8x128xbf16>, vector<128x128xbf16>, vector<8x128xf32> -> vector<8x128xf32>
    %32 = vector.extract_strided_slice %0 {offsets = [3, 0], sizes = [1, 128], strides = [1, 1]} : vector<8x128xf32> to vector<1x128xf32>
    %33 = vector.broadcast %32 : vector<1x128xf32> to vector<8x128xf32>
    %34 = arith.addf %31, %33 : vector<8x128xf32>
    %cst_18 = arith.constant 0.000000e+00 : f32
    %35 = vector.broadcast %cst_18 : f32 to vector<8x128xf32>
    %36 = arith.maximumf %34, %35 : vector<8x128xf32>
    %37 = arith.truncf %36 : vector<8x128xf32> to vector<8x128xbf16>
    %c4 = arith.constant 4 : index
    %c0_19 = arith.constant 0 : index
    %c0_20 = arith.constant 0 : index
    %38 = vector.load %arg2[%c4, %c0_19, %c0_20] : memref<8x128x128xbf16, #tpu.memory_space<vmem>>, vector<1x128x128xbf16>
    %39 = vector.shape_cast %38 : vector<1x128x128xbf16> to vector<128x128xbf16>
    %cst_21 = arith.constant dense<0.000000e+00> : vector<8x128xf32>
    %40 = tpu.matmul %37, %39, %cst_21 {dimension_numbers = #tpu.dot_dimension_numbers<[1], [0], [0], [1], [0, 0, 1, 1], [], []>} : vector<8x128xbf16>, vector<128x128xbf16>, vector<8x128xf32> -> vector<8x128xf32>
    %41 = vector.extract_strided_slice %0 {offsets = [4, 0], sizes = [1, 128], strides = [1, 1]} : vector<8x128xf32> to vector<1x128xf32>
    %42 = vector.broadcast %41 : vector<1x128xf32> to vector<8x128xf32>
    %43 = arith.addf %40, %42 : vector<8x128xf32>
    %c0_22 = arith.constant 0 : index
    %c0_23 = arith.constant 0 : index
    %44 = vector.load %arg5[%c0_22, %c0_23] : memref<8x128xf32, #tpu.memory_space<vmem>>, vector<8x128xf32>
    tpu.vector_store %arg5[%c0_22, %c0_23], %43 {strides = array<i32>} : memref<8x128xf32, #tpu.memory_space<vmem>>, vector<8x128xf32>,
    %45 = arith.truncf %43 : vector<8x128xf32> to vector<8x128xbf16>
    %c5 = arith.constant 5 : index
    %c0_24 = arith.constant 0 : index
    %c0_25 = arith.constant 0 : index
    %46 = vector.load %arg2[%c5, %c0_24, %c0_25] : memref<8x128x128xbf16, #tpu.memory_space<vmem>>, vector<1x128x128xbf16>
    %47 = vector.shape_cast %46 : vector<1x128x128xbf16> to vector<128x128xbf16>
    %cst_26 = arith.constant dense<0.000000e+00> : vector<8x128xf32>
    %48 = tpu.matmul %45, %47, %cst_26 {dimension_numbers = #tpu.dot_dimension_numbers<[1], [0], [0], [1], [0, 0, 1, 1], [], []>} : vector<8x128xbf16>, vector<128x128xbf16>, vector<8x128xf32> -> vector<8x128xf32>
    %49 = vector.extract_strided_slice %0 {offsets = [5, 0], sizes = [1, 128], strides = [1, 1]} : vector<8x128xf32> to vector<1x128xf32>
    %50 = vector.broadcast %49 : vector<1x128xf32> to vector<8x128xf32>
    %51 = arith.addf %48, %50 : vector<8x128xf32>
    %cst_27 = arith.constant 0.000000e+00 : f32
    %52 = vector.broadcast %cst_27 : f32 to vector<8x128xf32>
    %53 = arith.maximumf %51, %52 : vector<8x128xf32>
    %54 = arith.truncf %53 : vector<8x128xf32> to vector<8x128xbf16>
    %c6 = arith.constant 6 : index
    %c0_28 = arith.constant 0 : index
    %c0_29 = arith.constant 0 : index
    %55 = vector.load %arg2[%c6, %c0_28, %c0_29] : memref<8x128x128xbf16, #tpu.memory_space<vmem>>, vector<1x128x128xbf16>
    %56 = vector.shape_cast %55 : vector<1x128x128xbf16> to vector<128x128xbf16>
    %cst_30 = arith.constant dense<0.000000e+00> : vector<8x128xf32>
    %57 = tpu.matmul %54, %56, %cst_30 {dimension_numbers = #tpu.dot_dimension_numbers<[1], [0], [0], [1], [0, 0, 1, 1], [], []>} : vector<8x128xbf16>, vector<128x128xbf16>, vector<8x128xf32> -> vector<8x128xf32>
    %58 = vector.extract_strided_slice %0 {offsets = [6, 0], sizes = [1, 128], strides = [1, 1]} : vector<8x128xf32> to vector<1x128xf32>
    %59 = vector.broadcast %58 : vector<1x128xf32> to vector<8x128xf32>
    %60 = arith.addf %57, %59 : vector<8x128xf32>
    %cst_31 = arith.constant 0.000000e+00 : f32
    %61 = vector.broadcast %cst_31 : f32 to vector<8x128xf32>
    %62 = arith.maximumf %60, %61 : vector<8x128xf32>
    %63 = arith.truncf %62 : vector<8x128xf32> to vector<8x128xbf16>
    %c7 = arith.constant 7 : index
    %c0_32 = arith.constant 0 : index
    %c0_33 = arith.constant 0 : index
    %64 = vector.load %arg2[%c7, %c0_32, %c0_33] : memref<8x128x128xbf16, #tpu.memory_space<vmem>>, vector<1x128x128xbf16>
    %65 = vector.shape_cast %64 : vector<1x128x128xbf16> to vector<128x128xbf16>
    %cst_34 = arith.constant dense<0.000000e+00> : vector<8x128xf32>
    %66 = tpu.matmul %63, %65, %cst_34 {dimension_numbers = #tpu.dot_dimension_numbers<[1], [0], [0], [1], [0, 0, 1, 1], [], []>} : vector<8x128xbf16>, vector<128x128xbf16>, vector<8x128xf32> -> vector<8x128xf32>
    %67 = vector.extract_strided_slice %0 {offsets = [7, 0], sizes = [1, 128], strides = [1, 1]} : vector<8x128xf32> to vector<1x128xf32>
    %68 = vector.broadcast %67 : vector<1x128xf32> to vector<8x128xf32>
    %69 = arith.addf %66, %68 : vector<8x128xf32>
    %c0_35 = arith.constant 0 : index
    %c0_36 = arith.constant 0 : index
    %70 = vector.load %arg4[%c0_35, %c0_36] : memref<8x128xf32, #tpu.memory_space<vmem>>, vector<8x128xf32>
    tpu.vector_store %arg4[%c0_35, %c0_36], %69 {strides = array<i32>} : memref<8x128xf32, #tpu.memory_space<vmem>>, vector<8x128xf32>,
    return
  }
  func.func @transform_0(%arg0: i32) -> (i32, i32) {
    %c0_i32 = arith.constant 0 : i32
    %c0_i32_0 = arith.constant 0 : i32
    return %arg0, %c0_i32 : i32, i32
  }
  func.func @transform_1(%arg0: i32) -> (i32, i32, i32) {
    %c0_i32 = arith.constant 0 : i32
    %c0_i32_0 = arith.constant 0 : i32
    %c0_i32_1 = arith.constant 0 : i32
    %c0_i32_2 = arith.constant 0 : i32
    return %c0_i32, %c0_i32_0, %c0_i32_1 : i32, i32, i32
  }
  func.func @transform_2(%arg0: i32) -> (i32, i32) {
    %c0_i32 = arith.constant 0 : i32
    %c0_i32_0 = arith.constant 0 : i32
    %c0_i32_1 = arith.constant 0 : i32
    return %c0_i32, %c0_i32_0 : i32, i32
  }
  func.func @transform_3(%arg0: i32) -> (i32, i32) {
    %c0_i32 = arith.constant 0 : i32
    %c0_i32_0 = arith.constant 0 : i32
    return %arg0, %c0_i32 : i32, i32
  }
  func.func @transform_4(%arg0: i32) -> (i32, i32) {
    %c0_i32 = arith.constant 0 : i32
    %c0_i32_0 = arith.constant 0 : i32
    return %arg0, %c0_i32 : i32, i32
  }
}

</mosaic_0001>

<bundles_post_ra>
// kernel: tpu_custom_call.1
= control target key start
LH: loop header
LB: loop body
LE: loop exit
PB: predicated region body
PF: predicated region fallthrough
CT: control target
= control target key end

     0   :  { %10 = vsyncpa [#allocation3], 0  ;;  %s1600_s0 = inlined_call_operand.hbm [shape: bf16[8,128], index: 0, kind: input, shape index: {}]   ;;  %s1601_s1 = inlined_call_operand.hbm [shape: bf16[8,128,128], index: 1, kind: input, shape index: {}]   ;;  %s1602_s2 = inlined_call_operand.hbm [shape: f32[8,128], index: 2, kind: input, shape index: {}]   ;;  %s1603_s3 = inlined_call_operand.hbm [shape: f32[8,128], index: 3, kind: output, shape index: {0}]   ;;  %s1604_s4 = inlined_call_operand.hbm [shape: f32[8,128], index: 4, kind: output, shape index: {1}]  }
   0x1   :  { %11 = vsyncpa [#allocation6], 0 }
   0x2   :  { %12 = vsyncpa [#allocation4], 0 }
   0x3   :  { %13 = vsyncpa [#allocation10], 0  ;;  %s1451_s15 = smov [#allocation5]  }
   0x4   :  { %s29_s16 = sshll.u32 %s1451_s15, 4  ;;  %s30_s16 = int_to_ptr.vmem [resolvable:$true] %s29_s16 }
   0x5   :  { %s1351_s17 = scalar_lea.vmem %s30_s16, 8192  ;;  %p1356_p1 = scmp.lt.s32.totalorder %s30_s16, %s30_s16 }
   0x6   :  { %p1352_p0 = scmp.ne.s32.totalorder %s30_s16, %s1351_s17  ;;  %p1357_p2 = scmp.lt.s32.totalorder %s1351_s17, %s1351_s17 }
   0x8   :  { %p1358_p3 = por %p1357_p2, %p1356_p1 }
   0xa   :  { %p1359_p4 = pnand %p1358_p3, %p1352_p0 }
   0xc   :  { %1362 = shalt.err (!%p1359_p4)
}
   0xd   :  { %s1452_s18 = smov 64   ;;  %s1453_s19 = smov 4  }
   0xe   :  { %35 = dma.hbm_to_vmem [thread:$0]  %s1601_s1, 8192, %s30_s16, [#allocation6], %s1452_s18, %s1452_s18, %s1453_s19  }
   0xf   :  { %s1454_s22 = smov [#allocation2]   ;;  %s1455_s24 = smov [#allocation7]  }
  0x10   :  { %s20_s23 = sshll.u32 %s1454_s22, 4  ;;  %s42_s25 = sshll.u32 %s1455_s24, 4  ;;  %s21_s23 = int_to_ptr.vmem [resolvable:$true] %s20_s23  ;;  %s43_s25 = int_to_ptr.vmem [resolvable:$true] %s42_s25 }
  0x11   :  { %s1371_s26 = scalar_lea.vmem %s21_s23, 64  ;;  %p1376_p6 = scmp.lt.s32.totalorder %s21_s23, %s21_s23 }
  0x12   :  { %p1372_p5 = scmp.ne.s32.totalorder %s21_s23, %s1371_s26  ;;  %p1377_p7 = scmp.lt.s32.totalorder %s1371_s26, %s1371_s26 }
  0x14   :  { %p1378_p8 = por %p1377_p7, %p1376_p6 }
  0x16   :  { %p1379_p9 = pnand %p1378_p8, %p1372_p5 }
  0x18   :  { %1382 = shalt.err (!%p1379_p9)
}
  0x19   :  { %23 = dma.hbm_to_vmem [thread:$0]  %s1600_s0, 64, %s21_s23, [#allocation3]  }
  0x1a   :  { %s1391_s29 = scalar_lea.vmem %s43_s25, 128  ;;  %p1396_p11 = scmp.lt.s32.totalorder %s43_s25, %s43_s25 }
  0x1b   :  { %p1392_p10 = scmp.ne.s32.totalorder %s43_s25, %s1391_s29  ;;  %p1397_p12 = scmp.lt.s32.totalorder %s1391_s29, %s1391_s29 }
  0x1d   :  { %p1398_p13 = por %p1397_p12, %p1396_p11 }
  0x1f   :  { %p1399_p0 = pnand %p1398_p13, %p1392_p10 }
  0x21   :  { %1402 = shalt.err (!%p1399_p0)
}
  0x22   :  { %45 = dma.hbm_to_vmem [thread:$0]  %s1602_s2, 128, %s43_s25, [#allocation6]  }
  0x23   :  { %1443 = dma.done.wait [#allocation3], 64  }
  0x24   :  { %1444 = vsyncadd [#allocation3], 4294967232 }
  0x25   :  { %1445 = dma.done.wait [#allocation6], 8320  }
  0x26   :  { %1446 = vsyncadd [#allocation6], 4294958976  ;;  %v1456_v0 = vmov 0.0   ;;  %vm1457_vm0 = vmmov 0   ;;  %v1279_v1 = vld [vmem:[#allocation5 + $0x38] sm:$0xff]   ;;  %v1280_v2 = vld [vmem:[#allocation5 + $0x30] sm:$0xff]   ;;  %v74_v24 = vlaneseq }
  0x27   :  { %1110 = vmatprep.subr.bf16.mxu0 %v1456_v0  ;;  %1126 = vmatprep.mubr.msk.bf16.mxu0 %vm1457_vm0, %v1456_v0  ;;  %v1281_v3 = vld [vmem:[#allocation5 + $0x28] sm:$0xff]   ;;  %v1287_v4 = vld [vmem:[#allocation5 + $0x78] sm:$0xff]   ;;  %v1282_v5 = vld [vmem:[#allocation5 + $0x20] sm:$0xff]   ;;  %s1458_s0 = smov [#allocation9]  }
  0x28   :  { %1130 = vmatprep.subr.bf16.mxu1 %v1456_v0  ;;  %1146 = vmatprep.mubr.msk.bf16.mxu1 %vm1457_vm0, %v1456_v0  ;;  %v1288_v6 = vld [vmem:[#allocation5 + $0x70] sm:$0xff]   ;;  %v1283_v7 = vld [vmem:[#allocation5 + $0x18] sm:$0xff]   ;;  %v1289_v8 = vld [vmem:[#allocation5 + $0x68] sm:$0xff]   ;;  %v1524_v25 = vshrl.u32 %v74_v24, 7  ;;  %s960_s2 = sshll.u32 %s1458_s0, 4  ;;  %s961_s2 = int_to_ptr.vmem [resolvable:$true] %s960_s2 }
  0x29   :  { %1111 = vmatpush3.bf16.msra.mxu0 %v1279_v1  ;;  %1131 = vmatpush3.bf16.msra.mxu1 %v1287_v4  ;;  %v1284_v9 = vld [vmem:[#allocation5 + $0x10] sm:$0xff]   ;;  %v1290_v10 = vld [vmem:[#allocation5 + $0x60] sm:$0xff]   ;;  %v1285_v11 = vld [vmem:[#allocation5 + $0x8] sm:$0xff]   ;;  %s1403_s5 = scalar_lea.vmem %s961_s2, 128  ;;  %p1408_p2 = scmp.lt.s32.totalorder %s961_s2, %s961_s2 }
  0x2a   :  { %1112 = vmatprep.subr.bf16.mxu0 %v1456_v0  ;;  %1132 = vmatprep.subr.bf16.mxu1 %v1456_v0  ;;  %v1291_v12 = vld [vmem:[#allocation5 + $0x58] sm:$0xff]   ;;  %v1286_v13 = vld [vmem:[#allocation5] sm:$0xff]   ;;  %v1292_v14 = vld [vmem:[#allocation5 + $0x50] sm:$0xff]   ;;  %v76_v26 = vsub.s32 0, %v1524_v25  ;;  %v187_v44 = vsub.s32 1, %v1524_v25  ;;  %v298_v61 = vsub.s32 2, %v1524_v25  ;;  %p1404_p1 = scmp.ne.s32.totalorder %s961_s2, %s1403_s5  ;;  %p1409_p3 = scmp.lt.s32.totalorder %s1403_s5, %s1403_s5 }
  0x2b   :  { %v57_v15 = vld [vmem:[#allocation2] sm:$0xf]  ;;  %v1293_v16 = vld [vmem:[#allocation5 + $0x48] sm:$0xff]   ;;  %v1294_v17 = vld [vmem:[#allocation5 + $0x40] sm:$0xff]  }
  0x2c   :  { %v1295_v18 = vld [vmem:[#allocation5 + $0xb8] sm:$0xff]   ;;  %v1296_v19 = vld [vmem:[#allocation5 + $0xb0] sm:$0xff]   ;;  %v1297_v20 = vld [vmem:[#allocation5 + $0xa8] sm:$0xff]   ;;  %p1410_p4 = por %p1409_p3, %p1408_p2 }
  0x2d   :  { %1113 = vmatpush3.bf16.msra.mxu0 %v1280_v2  ;;  %1133 = vmatpush3.bf16.msra.mxu1 %v1288_v6  ;;  %v1298_v21 = vld [vmem:[#allocation5 + $0xa0] sm:$0xff]   ;;  %v1299_v22 = vld [vmem:[#allocation5 + $0x98] sm:$0xff]   ;;  %v1300_v23 = vld [vmem:[#allocation5 + $0x90] sm:$0xff]  }
  0x2e   :  { %1114 = vmatprep.subr.bf16.mxu0 %v1456_v0  ;;  %1134 = vmatprep.subr.bf16.mxu1 %v1456_v0  ;;  %v1527_v27 = vld [vmem:[#allocation7] sm:$0xff]  ;;  %v1301_v36 = vld [vmem:[#allocation5 + $0x88] sm:$0xff]   ;;  %v1303_v38 = vld [vmem:[#allocation5 + $0xf8] sm:$0xff]   ;;  %p1411_p5 = pnand %p1410_p4, %p1404_p1 }
  0x2f   :  { %v77_v28 = vrot.slane %v1527_v27, %v76_v26  ;;  %v1302_v37 = vld [vmem:[#allocation5 + $0x80] sm:$0xff]   ;;  %v1304_v39 = vld [vmem:[#allocation5 + $0xf0] sm:$0xff]   ;;  %v1305_v40 = vld [vmem:[#allocation5 + $0xe8] sm:$0xff]   ;;  %v188_v45 = vrot.slane %v1527_v27, %v187_v44  ;;  %v299_v62 = vrot.slane %v1527_v27, %v298_v61  ;;  %v742_v61 = vsub.s32 6, %v1524_v25 }
  0x30   :  { %v1306_v41 = vld [vmem:[#allocation5 + $0xe0] sm:$0xff]   ;;  %v1307_v42 = vld [vmem:[#allocation5 + $0xd8] sm:$0xff]   ;;  %v1308_v43 = vld [vmem:[#allocation5 + $0xd0] sm:$0xff]  }
  0x31   :  { %1115 = vmatpush3.bf16.msra.mxu0 %v1281_v3  ;;  %1135 = vmatpush3.bf16.msra.mxu1 %v1289_v8  ;;  %v1309_v53 = vld [vmem:[#allocation5 + $0xc8] sm:$0xff]   ;;  %v1310_v54 = vld [vmem:[#allocation5 + $0xc0] sm:$0xff]   ;;  %v1311_v55 = vld [vmem:[#allocation5 + $0x138] sm:$0xff]  }
  0x32   :  { %1116 = vmatprep.subr.bf16.mxu0 %v1456_v0  ;;  %1136 = vmatprep.subr.bf16.mxu1 %v1456_v0  ;;  %v1312_v56 = vld [vmem:[#allocation5 + $0x130] sm:$0xff]   ;;  %v1313_v57 = vld [vmem:[#allocation5 + $0x128] sm:$0xff]   ;;  %v1314_v58 = vld [vmem:[#allocation5 + $0x120] sm:$0xff]  }
  0x33   :  { %v1315_v59 = vld [vmem:[#allocation5 + $0x118] sm:$0xff]   ;;  %v1316_v60 = vld [vmem:[#allocation5 + $0x110] sm:$0xff]   ;;  %v1318_v8 = vld [vmem:[#allocation5 + $0x100] sm:$0xff]  }
  0x34   :  { %v1326_v26 = vld [vmem:[#allocation5 + $0x140] sm:$0xff]   ;;  %v1335_v44 = vld [vmem:[#allocation5 + $0x1f8] sm:$0xff]  }
  0x35   :  { %1117 = vmatpush3.bf16.msra.mxu0 %v1282_v5  ;;  %1137 = vmatpush3.bf16.msra.mxu1 %v1290_v10  ;;  %v1320_v10 = vld [vmem:[#allocation5 + $0x170] sm:$0xff]  }
  0x36   :  { %1118 = vmatprep.subr.bf16.mxu0 %v1456_v0  ;;  %1138 = vmatprep.subr.bf16.mxu1 %v1456_v0 }
  0x39   :  { %1119 = vmatpush3.bf16.msra.mxu0 %v1283_v7  ;;  %1139 = vmatpush3.bf16.msra.mxu1 %v1291_v12  ;;  %v1317_v7 = vld [vmem:[#allocation5 + $0x108] sm:$0xff]   ;;  %v1322_v12 = vld [vmem:[#allocation5 + $0x160] sm:$0xff]  }
  0x3a   :  { %1120 = vmatprep.subr.bf16.mxu0 %v1456_v0  ;;  %1140 = vmatprep.subr.bf16.mxu1 %v1456_v0 }
  0x3d   :  { %1121 = vmatpush3.bf16.msra.mxu0 %v1284_v9  ;;  %1141 = vmatpush3.bf16.msra.mxu1 %v1292_v14  ;;  %v1319_v9 = vld [vmem:[#allocation5 + $0x178] sm:$0xff]   ;;  %v1324_v14 = vld [vmem:[#allocation5 + $0x150] sm:$0xff]  }
  0x3e   :  { %1122 = vmatprep.subr.bf16.mxu0 %v1456_v0  ;;  %1142 = vmatprep.subr.bf16.mxu1 %v1456_v0 }
  0x41   :  { %1123 = vmatpush3.bf16.msra.mxu0 %v1285_v11  ;;  %1143 = vmatpush3.bf16.msra.mxu1 %v1293_v16  ;;  %v1321_v11 = vld [vmem:[#allocation5 + $0x168] sm:$0xff]   ;;  %v409_v16 = vsub.s32 3, %v1524_v25 }
  0x42   :  { %1124 = vmatprep.subr.bf16.mxu0 %v1456_v0  ;;  %1144 = vmatprep.subr.bf16.mxu1 %v1456_v0 }
  0x45   :  { %1125 = vmatpush3.bf16.msra.mxu0 %v1286_v13  ;;  %1145 = vmatpush3.bf16.msra.mxu1 %v1294_v17  ;;  %v1323_v13 = vld [vmem:[#allocation5 + $0x158] sm:$0xff]   ;;  %v410_v17 = vrot.slane %v1527_v27, %v409_v16 }
  0x46   :  { %1150 = vmatprep.subr.bf16.mxu0 %v1456_v0  ;;  %1170 = vmatprep.subr.bf16.mxu1 %v1456_v0 }
  0x48   :  { %1127 = vmatmul.mubr.bf16.vlgmr.msra.gmra.mxu0 %v57_v15  ;;  %v1325_v15 = vld [vmem:[#allocation5 + $0x148] sm:$0xff]  }
  0x49   :  { %1166 = vmatprep.mubr.msk.bf16.mxu0 %vm1457_vm0, %v1456_v0  ;;  %1151 = vmatpush3.bf16.msra.mxu0 %v1295_v18 }
  0x4a   :  { %1152 = vmatprep.subr.bf16.mxu0 %v1456_v0 }
  0x4d   :  { %1153 = vmatpush3.bf16.msra.mxu0 %v1296_v19 }
  0x4e   :  { %1154 = vmatprep.subr.bf16.mxu0 %v1456_v0 }
  0x51   :  { %1155 = vmatpush3.bf16.msra.mxu0 %v1297_v20 }
  0x52   :  { %1156 = vmatprep.subr.bf16.mxu0 %v1456_v0 }
  0x55   :  { %1157 = vmatpush3.bf16.msra.mxu0 %v1298_v21 }
  0x56   :  { %1158 = vmatprep.subr.bf16.mxu0 %v1456_v0 }
  0x59   :  { %1159 = vmatpush3.bf16.msra.mxu0 %v1299_v22 }
  0x5a   :  { %1160 = vmatprep.subr.bf16.mxu0 %v1456_v0 }
  0x5d   :  { %1161 = vmatpush3.bf16.msra.mxu0 %v1300_v23 }
  0x5e   :  { %1162 = vmatprep.subr.bf16.mxu0 %v1456_v0 }
  0x61   :  { %1163 = vmatpush3.bf16.msra.mxu0 %v1301_v36 }
  0x62   :  { %1164 = vmatprep.subr.bf16.mxu0 %v1456_v0 }
  0x65   :  { %1165 = vmatpush3.bf16.msra.mxu0 %v1302_v37 }
  0x66   :  { %1190 = vmatprep.subr.bf16.mxu0 %v1456_v0 }
 0x108   :  { %v160_v29 = vpop.f32.mrf.mxu0 }
 0x109   :  { %v161_v30 = vadd.f32 %v160_v29, %v77_v28  ;;  %v1327_v28 = vld [vmem:[#allocation5 + $0x1b8] sm:$0xff]   ;;  %v1328_v29 = vld [vmem:[#allocation5 + $0x1b0] sm:$0xff]  }
 0x10a   :  { %v1128_v31 = vpop.f32.mrf.mxu0 }
 0x10b   :  { %v166_v32 = vmax.f32 %v161_v30, 0.0  ;;  %v1329_v30 = vld [vmem:[#allocation5 + $0x1a8] sm:$0xff]   ;;  %v1330_v31 = vld [vmem:[#allocation5 + $0x1a0] sm:$0xff]  }
 0x10c   :  { %v163_v33 = vpop.f32.mrf.mxu0 }
 0x10d   :  { %v167_v34 = vpack.c.bf16 %v166_v32, %v166_v32  ;;  %v1331_v32 = vld [vmem:[#allocation5 + $0x198] sm:$0xff]   ;;  %v1332_v33 = vld [vmem:[#allocation5 + $0x190] sm:$0xff]  }
 0x10e   :  { %v1129_v35 = vpop.f32.mrf.mxu0 }
 0x10f   :  { %1147 = vmatmul.mubr.bf16.vlgmr.msra.gmra.mxu1 %v167_v34  ;;  %v520_v34 = vsub.s32 4, %v1524_v25 }
 0x110   :  { %1186 = vmatprep.mubr.msk.bf16.mxu1 %vm1457_vm0, %v1456_v0  ;;  %1171 = vmatpush3.bf16.msra.mxu1 %v1303_v38 }
 0x111   :  { %1172 = vmatprep.subr.bf16.mxu1 %v1456_v0  ;;  %v521_v35 = vrot.slane %v1527_v27, %v520_v34 }
 0x114   :  { %1173 = vmatpush3.bf16.msra.mxu1 %v1304_v39 }
 0x115   :  { %1174 = vmatprep.subr.bf16.mxu1 %v1456_v0 }
 0x118   :  { %1175 = vmatpush3.bf16.msra.mxu1 %v1305_v40 }
 0x119   :  { %1176 = vmatprep.subr.bf16.mxu1 %v1456_v0 }
 0x11c   :  { %1177 = vmatpush3.bf16.msra.mxu1 %v1306_v41 }
 0x11d   :  { %1178 = vmatprep.subr.bf16.mxu1 %v1456_v0 }
 0x120   :  { %1179 = vmatpush3.bf16.msra.mxu1 %v1307_v42  ;;  %v1333_v42 = vld [vmem:[#allocation5 + $0x188] sm:$0xff]  }
 0x121   :  { %1180 = vmatprep.subr.bf16.mxu1 %v1456_v0 }
 0x124   :  { %1181 = vmatpush3.bf16.msra.mxu1 %v1308_v43  ;;  %v1334_v43 = vld [vmem:[#allocation5 + $0x180] sm:$0xff]  }
 0x125   :  { %1182 = vmatprep.subr.bf16.mxu1 %v1456_v0 }
 0x128   :  { %1183 = vmatpush3.bf16.msra.mxu1 %v1309_v53 }
 0x129   :  { %1184 = vmatprep.subr.bf16.mxu1 %v1456_v0 }
 0x12c   :  { %1185 = vmatpush3.bf16.msra.mxu1 %v1310_v54 }
 0x12d   :  { %1210 = vmatprep.subr.bf16.mxu1 %v1456_v0 }
 0x1cf   :  { %v271_v46 = vpop.f32.mrf.mxu1 }
 0x1d0   :  { %v272_v47 = vadd.f32 %v271_v46, %v188_v45  ;;  %v1336_v45 = vld [vmem:[#allocation5 + $0x1f0] sm:$0xff]   ;;  %v1337_v46 = vld [vmem:[#allocation5 + $0x1e8] sm:$0xff]  }
 0x1d1   :  { %v1148_v48 = vpop.f32.mrf.mxu1 }
 0x1d2   :  { %v277_v49 = vmax.f32 %v272_v47, 0.0  ;;  %v1338_v47 = vld [vmem:[#allocation5 + $0x1e0] sm:$0xff]   ;;  %v1339_v48 = vld [vmem:[#allocation5 + $0x1d8] sm:$0xff]  }
 0x1d3   :  { %v274_v50 = vpop.f32.mrf.mxu1 }
 0x1d4   :  { %v278_v51 = vpack.c.bf16 %v277_v49, %v277_v49  ;;  %v1340_v49 = vld [vmem:[#allocation5 + $0x1d0] sm:$0xff]   ;;  %v631_v50 = vsub.s32 5, %v1524_v25 }
 0x1d5   :  { %v1149_v52 = vpop.f32.mrf.mxu1 }
 0x1d6   :  { %1167 = vmatmul.mubr.bf16.vlgmr.msra.gmra.mxu0 %v278_v51  ;;  %v632_v51 = vrot.slane %v1527_v27, %v631_v50 }
 0x1d7   :  { %1206 = vmatprep.mubr.msk.bf16.mxu0 %vm1457_vm0, %v1456_v0  ;;  %1191 = vmatpush3.bf16.msra.mxu0 %v1311_v55 }
 0x1d8   :  { %1192 = vmatprep.subr.bf16.mxu0 %v1456_v0 }
 0x1db   :  { %1193 = vmatpush3.bf16.msra.mxu0 %v1312_v56 }
 0x1dc   :  { %1194 = vmatprep.subr.bf16.mxu0 %v1456_v0 }
 0x1df   :  { %1195 = vmatpush3.bf16.msra.mxu0 %v1313_v57 }
 0x1e0   :  { %1196 = vmatprep.subr.bf16.mxu0 %v1456_v0 }
 0x1e3   :  { %1197 = vmatpush3.bf16.msra.mxu0 %v1314_v58 }
 0x1e4   :  { %1198 = vmatprep.subr.bf16.mxu0 %v1456_v0 }
 0x1e7   :  { %1199 = vmatpush3.bf16.msra.mxu0 %v1315_v59  ;;  %v1341_v59 = vld [vmem:[#allocation5 + $0x1c8] sm:$0xff]  }
 0x1e8   :  { %1200 = vmatprep.subr.bf16.mxu0 %v1456_v0 }
 0x1eb   :  { %1201 = vmatpush3.bf16.msra.mxu0 %v1316_v60  ;;  %v1342_v60 = vld [vmem:[#allocation5 + $0x1c0] sm:$0xff]  }
 0x1ec   :  { %1202 = vmatprep.subr.bf16.mxu0 %v1456_v0 }
 0x1ef   :  { %1203 = vmatpush3.bf16.msra.mxu0 %v1317_v7 }
 0x1f0   :  { %1204 = vmatprep.subr.bf16.mxu0 %v1456_v0 }
 0x1f3   :  { %1205 = vmatpush3.bf16.msra.mxu0 %v1318_v8 }
 0x1f4   :  { %1230 = vmatprep.subr.bf16.mxu0 %v1456_v0 }
 0x296   :  { %v382_v63 = vpop.f32.mrf.mxu0 }
 0x297   :  { %v383_v1 = vadd.f32 %v382_v63, %v299_v62  ;;  %v743_v62 = vrot.slane %v1527_v27, %v742_v61 }
 0x298   :  { %v1168_v2 = vpop.f32.mrf.mxu0 }
 0x299   :  { %v388_v3 = vmax.f32 %v383_v1, 0.0 }
 0x29a   :  { %v385_v4 = vpop.f32.mrf.mxu0 }
 0x29b   :  { %v389_v5 = vpack.c.bf16 %v388_v3, %v388_v3 }
 0x29c   :  { %v1169_v6 = vpop.f32.mrf.mxu0 }
 0x29d   :  { %1187 = vmatmul.mubr.bf16.vlgmr.msra.gmra.mxu1 %v389_v5 }
 0x29e   :  { %1226 = vmatprep.mubr.msk.bf16.mxu1 %vm1457_vm0, %v1456_v0  ;;  %1211 = vmatpush3.bf16.msra.mxu1 %v1319_v9 }
 0x29f   :  { %1212 = vmatprep.subr.bf16.mxu1 %v1456_v0 }
 0x2a2   :  { %1213 = vmatpush3.bf16.msra.mxu1 %v1320_v10 }
 0x2a3   :  { %1214 = vmatprep.subr.bf16.mxu1 %v1456_v0 }
 0x2a6   :  { %1215 = vmatpush3.bf16.msra.mxu1 %v1321_v11 }
 0x2a7   :  { %1216 = vmatprep.subr.bf16.mxu1 %v1456_v0 }
 0x2aa   :  { %1217 = vmatpush3.bf16.msra.mxu1 %v1322_v12 }
 0x2ab   :  { %1218 = vmatprep.subr.bf16.mxu1 %v1456_v0 }
 0x2ae   :  { %1219 = vmatpush3.bf16.msra.mxu1 %v1323_v13 }
 0x2af   :  { %1220 = vmatprep.subr.bf16.mxu1 %v1456_v0 }
 0x2b2   :  { %1221 = vmatpush3.bf16.msra.mxu1 %v1324_v14 }
 0x2b3   :  { %1222 = vmatprep.subr.bf16.mxu1 %v1456_v0 }
 0x2b6   :  { %1223 = vmatpush3.bf16.msra.mxu1 %v1325_v15 }
 0x2b7   :  { %1224 = vmatprep.subr.bf16.mxu1 %v1456_v0 }
 0x2ba   :  { %1225 = vmatpush3.bf16.msra.mxu1 %v1326_v26 }
 0x2bb   :  { %1250 = vmatprep.subr.bf16.mxu1 %v1456_v0 }
 0x35d   :  { %v493_v18 = vpop.f32.mrf.mxu1 }
 0x35e   :  { %v494_v19 = vadd.f32 %v493_v18, %v410_v17 }
 0x35f   :  { %v1188_v20 = vpop.f32.mrf.mxu1 }
 0x360   :  { %v499_v21 = vmax.f32 %v494_v19, 0.0 }
 0x361   :  { %v496_v22 = vpop.f32.mrf.mxu1 }
 0x362   :  { %v500_v23 = vpack.c.bf16 %v499_v21, %v499_v21 }
 0x363   :  { %v1189_v24 = vpop.f32.mrf.mxu1 }
 0x364   :  { %1207 = vmatmul.mubr.bf16.vlgmr.msra.gmra.mxu0 %v500_v23 }
 0x365   :  { %1246 = vmatprep.mubr.msk.bf16.mxu0 %vm1457_vm0, %v1456_v0  ;;  %1231 = vmatpush3.bf16.msra.mxu0 %v1327_v28 }
 0x366   :  { %1232 = vmatprep.subr.bf16.mxu0 %v1456_v0 }
 0x369   :  { %1233 = vmatpush3.bf16.msra.mxu0 %v1328_v29 }
 0x36a   :  { %1234 = vmatprep.subr.bf16.mxu0 %v1456_v0 }
 0x36d   :  { %1235 = vmatpush3.bf16.msra.mxu0 %v1329_v30 }
 0x36e   :  { %1236 = vmatprep.subr.bf16.mxu0 %v1456_v0 }
 0x371   :  { %1237 = vmatpush3.bf16.msra.mxu0 %v1330_v31 }
 0x372   :  { %1238 = vmatprep.subr.bf16.mxu0 %v1456_v0 }
 0x375   :  { %1239 = vmatpush3.bf16.msra.mxu0 %v1331_v32 }
 0x376   :  { %1240 = vmatprep.subr.bf16.mxu0 %v1456_v0 }
 0x379   :  { %1241 = vmatpush3.bf16.msra.mxu0 %v1332_v33 }
 0x37a   :  { %1242 = vmatprep.subr.bf16.mxu0 %v1456_v0 }
 0x37d   :  { %1243 = vmatpush3.bf16.msra.mxu0 %v1333_v42 }
 0x37e   :  { %1244 = vmatprep.subr.bf16.mxu0 %v1456_v0 }
 0x381   :  { %1245 = vmatpush3.bf16.msra.mxu0 %v1334_v43 }
 0x424   :  { %v604_v36 = vpop.f32.mrf.mxu0 }
 0x425   :  { %v605_v37 = vadd.f32 %v604_v36, %v521_v35 }
 0x426   :  { %v1208_v38 = vpop.f32.mrf.mxu0 }
 0x427   :  { %v611_v39 = vpack.c.bf16 %v605_v37, %v605_v37  ;;  %610 = vst [vmem:[#allocation9] sm:$0xff] %v605_v37 }
 0x428   :  { %v607_v40 = vpop.f32.mrf.mxu0 }
 0x429   :  { %1227 = vmatmul.mubr.bf16.vlgmr.msra.gmra.mxu1 %v611_v39 }
 0x42a   :  { %v1209_v41 = vpop.f32.mrf.mxu0  ;;  %1266 = vmatprep.mubr.msk.bf16.mxu1 %vm1457_vm0, %v1456_v0  ;;  %1251 = vmatpush3.bf16.msra.mxu1 %v1335_v44 }
 0x42b   :  { %1252 = vmatprep.subr.bf16.mxu1 %v1456_v0 }
 0x42e   :  { %1253 = vmatpush3.bf16.msra.mxu1 %v1336_v45 }
 0x42f   :  { %1254 = vmatprep.subr.bf16.mxu1 %v1456_v0 }
 0x432   :  { %1255 = vmatpush3.bf16.msra.mxu1 %v1337_v46 }
 0x433   :  { %1256 = vmatprep.subr.bf16.mxu1 %v1456_v0 }
 0x436   :  { %1257 = vmatpush3.bf16.msra.mxu1 %v1338_v47 }
 0x437   :  { %1258 = vmatprep.subr.bf16.mxu1 %v1456_v0 }
 0x43a   :  { %1259 = vmatpush3.bf16.msra.mxu1 %v1339_v48 }
 0x43b   :  { %1260 = vmatprep.subr.bf16.mxu1 %v1456_v0 }
 0x43e   :  { %1261 = vmatpush3.bf16.msra.mxu1 %v1340_v49 }
 0x43f   :  { %1262 = vmatprep.subr.bf16.mxu1 %v1456_v0 }
 0x442   :  { %1263 = vmatpush3.bf16.msra.mxu1 %v1341_v59 }
 0x443   :  { %1264 = vmatprep.subr.bf16.mxu1 %v1456_v0 }
 0x446   :  { %1265 = vmatpush3.bf16.msra.mxu1 %v1342_v60 }
 0x4e9   :  { %v715_v52 = vpop.f32.mrf.mxu1 }
 0x4ea   :  { %v716_v53 = vadd.f32 %v715_v52, %v632_v51 }
 0x4eb   :  { %v1228_v54 = vpop.f32.mrf.mxu1 }
 0x4ec   :  { %v721_v55 = vmax.f32 %v716_v53, 0.0 }
 0x4ed   :  { %v718_v56 = vpop.f32.mrf.mxu1 }
 0x4ee   :  { %v722_v57 = vpack.c.bf16 %v721_v55, %v721_v55 }
 0x4ef   :  { %v1229_v58 = vpop.f32.mrf.mxu1 }
 0x4f0   :  { %1247 = vmatmul.mubr.bf16.vlgmr.msra.gmra.mxu0 %v722_v57 }
 0x5b0   :  { %v826_v63 = vpop.f32.mrf.mxu0 }
 0x5b1   :  { %v827_v1 = vadd.f32 %v826_v63, %v743_v62 }
 0x5b2   :  { %v1248_v2 = vpop.f32.mrf.mxu0 }
 0x5b3   :  { %v832_v3 = vmax.f32 %v827_v1, 0.0 }
 0x5b4   :  { %v829_v4 = vpop.f32.mrf.mxu0 }
 0x5b5   :  { %v833_v5 = vpack.c.bf16 %v832_v3, %v832_v3 }
 0x5b6   :  { %v1249_v6 = vpop.f32.mrf.mxu0 }
 0x5b7   :  { %1267 = vmatmul.mubr.bf16.vlgmr.msra.gmra.mxu1 %v833_v5 }
 0x5b8   :  { %1414 = shalt.err (!%p1411_p5)
}
 0x5b9   :  { %963 = dma.vmem_to_hbm [thread:$0]  %s961_s2, 128, %s1604_s4, [#allocation10]   ;;  %v853_v0 = vsub.s32 7, %v1524_v25 }
 0x5ba   :  { %s1459_s8 = smov [#allocation8]  }
 0x5bb   :  { %v854_v7 = vrot.slane %v1527_v27, %v853_v0  ;;  %s950_s9 = sshll.u32 %s1459_s8, 4  ;;  %s951_s9 = int_to_ptr.vmem [resolvable:$true] %s950_s9 }
 0x5bc   :  { %s1423_s10 = scalar_lea.vmem %s951_s9, 128  ;;  %p1428_p7 = scmp.lt.s32.totalorder %s951_s9, %s951_s9 }
 0x5bd   :  { %p1424_p6 = scmp.ne.s32.totalorder %s951_s9, %s1423_s10  ;;  %p1429_p8 = scmp.lt.s32.totalorder %s1423_s10, %s1423_s10 }
 0x5bf   :  { %p1430_p9 = por %p1429_p8, %p1428_p7 }
 0x5c1   :  { %p1431_p10 = pnand %p1430_p9, %p1424_p6 }
 0x677   :  { %v937_v8 = vpop.f32.mrf.mxu1 }
 0x678   :  { %v938_v9 = vadd.f32 %v937_v8, %v854_v7 }
 0x679   :  { %v1268_v10 = vpop.f32.mrf.mxu1 }
 0x67a   :  { %943 = vst [vmem:[#allocation8] sm:$0xff] %v938_v9 }
 0x67b   :  { %v940_v11 = vpop.f32.mrf.mxu1 }
 0x67c   :  { %1434 = shalt.err (!%p1431_p10)
}
 0x67d   :  { %953 = dma.vmem_to_hbm [thread:$0]  %s951_s9, 128, %s1603_s3, [#allocation4]   ;;  %v1269_v25 = vpop.f32.mrf.mxu1 }
 0x67e   :  { %1447 = dma.done.wait [#allocation4], 128  }
 0x67f   :  { %1448 = vsyncadd [#allocation4], 4294967168 }
 0x680   :  { %1449 = dma.done.wait [#allocation10], 128  }
 0x681   :  { %1450 = vsyncadd [#allocation10], 4294967168 }
 0x682   :  { %970 = vsyncpa [#allocation3], 1 }
 0x683   :  { %971 = vsyncpa [#allocation6], 1 }
 0x684   :  { %972 = vsyncpa [#allocation4], 1 }
 0x685   :  { %973 = vsyncpa [#allocation10], 1 }

</bundles_post_ra>
